<compile_context>
chip_gen: v7x
topology: tpu7x:2x2x1
jax: 0.10.0
libtpu: 0.0.40
codegen_flags: <defaults>
</compile_context>

<pallas_src>
import functools

import jax
import jax.numpy as jnp
from jax import lax
from jax.experimental import pallas as pl
from jax.experimental.pallas import tpu as pltpu

_LANES = 128
_ROW_ALIGN = 32                          # sublane packing of int8 labels
_MAX_ROWS = 2048                         # 2048 rows x 128 lanes = 262144 elems / tile
_TILE_VMEM_BUDGET = 32 * 1024 * 1024     # working-set budget used to size tiles
_VMEM_LIMIT = 48 * 1024 * 1024           # v7x-safe scoped-VMEM request (64 MiB physical)
_SMOOTH = 1e-06


def _round_down(x, m):
    return (x // m) * m


def _max_tile_rows(n_classes, pred_isz, lab_isz):
    # Per spatial row (128 elems): double-buffered pred + label input blocks plus
    # ~(2C + 4) live f32 planes of in-kernel intermediates (logits, e, m, denom, p_c).
    per_row = _LANES * (2 * n_classes * pred_isz + 2 * lab_isz + 4 * (2 * n_classes + 4))
    rows = _TILE_VMEM_BUDGET // per_row
    return int(max(_ROW_ALIGN, min(_MAX_ROWS, _round_down(rows, _ROW_ALIGN))))


def _pick_tile_rows(R, max_rows):
    """Rows per spatial tile (multiple of 32 for int8 sublane packing).  Prefers an
    exact divisor of R (no ragged tail); otherwise the fewest near-equal tiles."""
    cap = _round_down(min(R, max_rows), _ROW_ALIGN)
    if cap < _ROW_ALIGN:
        return 0
    for d in range(cap, _ROW_ALIGN - 1, -_ROW_ALIGN):
        if R % d == 0 and 4 * d >= cap:
            return d
    n_tiles = -(-R // cap)
    return max(_ROW_ALIGN, _round_down(R // n_tiles, _ROW_ALIGN))


def _dice_partial_kernel(lab_ref, pred_ref, num_ref, t2_ref, p2_ref, *, n_classes):
    """Per-(batch, class) partial sums over one spatial tile.

    lab_ref : (1, r, 128) int           -- integer class labels
    pred_ref: (1, C, r, 128) f32/bf16   -- logits
    num_ref : (1, 1, C) f32             -- sum (onehot - softmax)^2    (this batch)
    t2_ref  : (1, 1, C) f32             -- sum onehot^2 == class count (this batch)
    p2_ref  : (1, 1, C) f32             -- sum softmax^2               (this batch)
    """
    s = pl.program_id(1)

    @pl.when(s == 0)
    def _():
        num_ref[...] = jnp.zeros_like(num_ref)
        t2_ref[...] = jnp.zeros_like(t2_ref)
        p2_ref[...] = jnp.zeros_like(p2_ref)

    # Pass 1: softmax normalizer over the (leading) class axis, streamed per plane.
    logits = [pred_ref[0, c].astype(jnp.float32) for c in range(n_classes)]
    m = logits[0]
    for c in range(1, n_classes):
        m = jnp.maximum(m, logits[c])
    e = [jnp.exp(l - m) for l in logits]
    denom = e[0]
    for c in range(1, n_classes):
        denom = denom + e[c]
    inv = pl.reciprocal(denom, approx=False)   # exact: keeps the 1e-5 tolerance

    # Pass 2: per-class streaming reductions.  No (C, r, 128) iota / one-hot tensors;
    # each class plane is reduced immediately (selects instead of convert+multiply).
    labels = lab_ref[0].astype(jnp.int32)                      # widened once per tile
    cls_sel = lax.broadcasted_iota(jnp.int32, (n_classes, _LANES), 0)
    t_rows = jnp.zeros((n_classes, _LANES), jnp.float32)
    tp_rows = jnp.zeros((n_classes, _LANES), jnp.float32)
    p2_rows = jnp.zeros((n_classes, _LANES), jnp.float32)
    for c in range(n_classes):
        p_c = e[c] * inv
        hit = labels == c
        t_r = jnp.sum(jnp.where(hit, 1.0, 0.0), axis=0, keepdims=True)    # (1, 128)
        tp_r = jnp.sum(jnp.where(hit, p_c, 0.0), axis=0, keepdims=True)   # (1, 128)
        p2_r = jnp.sum(p_c * p_c, axis=0, keepdims=True)                  # (1, 128)
        sel = cls_sel == c                     # place this class's partials in row c
        t_rows = t_rows + jnp.where(sel, t_r, 0.0)
        tp_rows = tp_rows + jnp.where(sel, tp_r, 0.0)
        p2_rows = p2_rows + jnp.where(sel, p2_r, 0.0)

    t_sum = jnp.sum(t_rows, axis=1)                           # (C,)
    tp_sum = jnp.sum(tp_rows, axis=1)
    p2_sum = jnp.sum(p2_rows, axis=1)
    num_part = t_sum - 2.0 * tp_sum + p2_sum                  # == sum (onehot - p)^2

    num_ref[...] += num_part[None, None, :]
    t2_ref[...] += t_sum[None, None, :]
    p2_ref[...] += p2_sum[None, None, :]


def _partial_sums_jax(lab, pred):
    """lab (B, n) int, pred (B, C, n) float -> per-(batch, class) num/t2/p2 partials."""
    n_classes = pred.shape[1]
    p = jax.nn.softmax(pred.astype(jnp.float32), axis=1)
    onehot = (lab.astype(jnp.int32)[:, None, :]
              == jnp.arange(n_classes, dtype=jnp.int32)[None, :, None]).astype(jnp.float32)
    t2 = jnp.sum(onehot, axis=-1)
    tp = jnp.sum(onehot * p, axis=-1)
    p2 = jnp.sum(p * p, axis=-1)
    return t2 - 2.0 * tp + p2, t2, p2


def _dice_partial_sums(lab, pred):
    B, n_classes, S = pred.shape
    if S % _LANES != 0:
        # TODO(synk): spatial sizes that are not a multiple of 128 lanes take the
        # pure-JAX path so we never pay a full-tensor pad/copy of the logits in HBM.
        return _partial_sums_jax(lab, pred)

    R = S // _LANES
    max_rows = _max_tile_rows(n_classes, pred.dtype.itemsize, lab.dtype.itemsize)
    r_tile = _pick_tile_rows(R, max_rows)
    if r_tile == 0:
        return _partial_sums_jax(lab, pred)

    n_tiles = R // r_tile
    rows_main = n_tiles * r_tile

    lab_rows = lab.reshape(B, R, _LANES)                  # contiguous view: no HBM copy
    pred_rows = pred.reshape(B, n_classes, R, _LANES)     # contiguous view: no HBM copy

    kernel = functools.partial(_dice_partial_kernel, n_classes=n_classes)
    num, t2, p2 = pl.pallas_call(
        kernel,
        out_shape=[jax.ShapeDtypeStruct((B, 1, n_classes), jnp.float32)] * 3,
        grid_spec=pltpu.PrefetchScalarGridSpec(
            num_scalar_prefetch=0,
            grid=(B, n_tiles),
            in_specs=[
                pl.BlockSpec((1, r_tile, _LANES), lambda b, s: (b, s, 0)),
                pl.BlockSpec((1, n_classes, r_tile, _LANES), lambda b, s: (b, 0, s, 0)),
            ],
            out_specs=[
                pl.BlockSpec((1, 1, n_classes), lambda b, s: (b, 0, 0)),
                pl.BlockSpec((1, 1, n_classes), lambda b, s: (b, 0, 0)),
                pl.BlockSpec((1, 1, n_classes), lambda b, s: (b, 0, 0)),
            ],
        ),
        compiler_params=pltpu.CompilerParams(
            dimension_semantics=("parallel", "arbitrary"),
            vmem_limit_bytes=_VMEM_LIMIT,
        ),
    )(lab_rows, pred_rows)

    num = num.reshape(B, n_classes)
    t2 = t2.reshape(B, n_classes)
    p2 = p2.reshape(B, n_classes)

    if rows_main < R:       # small ragged tail (< one tile): fold in with plain JAX
        s0 = rows_main * _LANES
        num_t, t2_t, p2_t = _partial_sums_jax(lab[:, s0:], pred[:, :, s0:])
        num = num + num_t
        t2 = t2 + t2_t
        p2 = p2 + p2_t
    return num, t2, p2


@jax.jit
def weighted_dice_loss(y_true, y_pred, class_weights=None):
    """Matches WeightedDiceLoss.forward(y_true, y_pred).

    y_true: (B, 1, D, H, W) integer labels in [0, C)   (int8/int32 accepted)
    y_pred: (B, C, D, H, W) logits                     (f32 or bf16 accepted)
    class_weights: (C,) or None (None -> torch's 1/(count^2 + 1) per batch & class)
    """
    B, C, D, H, W = y_pred.shape
    S = D * H * W
    lab = y_true.reshape(B, S)
    pred = y_pred.reshape(B, C, S)

    num, t2, p2 = _dice_partial_sums(lab, pred)

    if class_weights is None:
        w = 1.0 / (jnp.square(t2) + 1.0)          # t2 == per-(batch, class) voxel count
    else:
        w = jnp.asarray(class_weights, dtype=jnp.float32).reshape(1, C)
    num_w = jnp.sum(num * w, axis=1)
    den_w = jnp.sum((t2 + p2 + _SMOOTH) * w, axis=1)
    # TODO(synk): on v7x with B == 1 a second leading "parallel" grid axis over spatial
    # halves would keep both TensorCores busy; not wired up here.
    return jnp.mean(num_w / den_w)


def _reference_loss(y_true, y_pred, class_weights=None):
    """Pure-JAX reference mirroring the PyTorch module."""
    C = y_pred.shape[1]
    onehot = jax.nn.one_hot(y_true[:, 0].astype(jnp.int32), C, dtype=jnp.float32)
    onehot = jnp.moveaxis(onehot, -1, 1)                          # (B, C, D, H, W)
    p = jax.nn.softmax(y_pred.astype(jnp.float32), axis=1)
    axes = (2, 3, 4)
    if class_weights is None:
        cw = jnp.sum(onehot, axis=axes)
        cw = 1.0 / (jnp.square(cw) + 1.0)
    else:
        cw = jnp.asarray(class_weights, jnp.float32)[None, :]
    num = jnp.sum(jnp.square(onehot - p), axis=axes) * cw
    den = (jnp.sum(jnp.square(onehot), axis=axes)
           + jnp.sum(jnp.square(p), axis=axes) + 1e-06) * cw
    return jnp.mean(jnp.sum(num, axis=1) / jnp.sum(den, axis=1))


if __name__ == "__main__":
    key = jax.random.PRNGKey(0)
    k1, k2 = jax.random.split(key)

    B, C, D, H, W = 2, 4, 16, 16, 16    # S = 4096 -> 32 lane-rows, one tile per batch
    y_pred = jax.random.normal(k1, (B, C, D, H, W), dtype=jnp.float32)
    y_true = jax.random.randint(k2, (B, 1, D, H, W), 0, C, dtype=jnp.int32)
    y_true = y_true.astype(jnp.int8)    # labels stay narrow in HBM; kernel widens them
    class_weights = jnp.array([1.0, 2.0, 0.5, 1.5], dtype=jnp.float32)

    # Provided class weights (the usual path for this module).
    loss_w = jax.block_until_ready(weighted_dice_loss(y_true, y_pred, class_weights))
    ref_w = _reference_loss(y_true, y_pred, class_weights)
    assert jnp.allclose(loss_w, ref_w, atol=1e-5, rtol=1e-5), (loss_w, ref_w)

    # class_weights=None path (torch computes 1/(count^2 + 1) from the one-hot).
    loss_n = jax.block_until_ready(weighted_dice_loss(y_true, y_pred, None))
    ref_n = _reference_loss(y_true, y_pred, None)
    assert jnp.allclose(loss_n, ref_n, atol=1e-5, rtol=1e-5), (loss_n, ref_n)

    print("KERNEL_OK")
</pallas_src>

<mosaic_0001>
module attributes {stable_mosaic.version = 11 : i64} {
  func.func @_dice_partial_kernel(%arg0: i32, %arg1: i32, %arg2: memref<1x32x128xi8, #tpu.memory_space<vmem>>, %arg3: memref<1x4x32x128xf32, #tpu.memory_space<vmem>>, %arg4: memref<1x1x4xf32, #tpu.memory_space<vmem>>, %arg5: memref<1x1x4xf32, #tpu.memory_space<vmem>>, %arg6: memref<1x1x4xf32, #tpu.memory_space<vmem>>) attributes {dimension_semantics = [#tpu.dimension_semantics<parallel>, #tpu.dimension_semantics<arbitrary>], iteration_bounds = array<i64: 2, 1>, scalar_prefetch = 0 : i64, scratch_operands = 0 : i64, tpu.core_type = #tpu.core_type<tc>, window_params = [{transform_indices = @transform_0, window_bounds = array<i64: 1, 32, 128>}, {transform_indices = @transform_1, window_bounds = array<i64: 1, 4, 32, 128>}, {transform_indices = @transform_2, window_bounds = array<i64: 1, 1, 4>}, {transform_indices = @transform_3, window_bounds = array<i64: 1, 1, 4>}, {transform_indices = @transform_4, window_bounds = array<i64: 1, 1, 4>}]} {
    %c0_i32 = arith.constant 0 : i32
    %0 = arith.cmpi eq, %arg1, %c0_i32 : i32
    %1 = arith.extui %0 : i1 to i32
    %c0_i32_0 = arith.constant 0 : i32
    %2 = arith.cmpi ne, %1, %c0_i32_0 : i32
    scf.if %2 {
      %cst_81 = arith.constant 0.000000e+00 : f32
      %180 = vector.broadcast %cst_81 : f32 to vector<1x1x4xf32>
      %c0_82 = arith.constant 0 : index
      %c0_83 = arith.constant 0 : index
      %c0_84 = arith.constant 0 : index
      %181 = vector.load %arg4[%c0_82, %c0_83, %c0_84] : memref<1x1x4xf32, #tpu.memory_space<vmem>>, vector<1x1x4xf32>
      tpu.vector_store %arg4[%c0_82, %c0_83, %c0_84], %180 {strides = array<i32>} : memref<1x1x4xf32, #tpu.memory_space<vmem>>, vector<1x1x4xf32>,
      %cst_85 = arith.constant 0.000000e+00 : f32
      %182 = vector.broadcast %cst_85 : f32 to vector<1x1x4xf32>
      %c0_86 = arith.constant 0 : index
      %c0_87 = arith.constant 0 : index
      %c0_88 = arith.constant 0 : index
      %183 = vector.load %arg5[%c0_86, %c0_87, %c0_88] : memref<1x1x4xf32, #tpu.memory_space<vmem>>, vector<1x1x4xf32>
      tpu.vector_store %arg5[%c0_86, %c0_87, %c0_88], %182 {strides = array<i32>} : memref<1x1x4xf32, #tpu.memory_space<vmem>>, vector<1x1x4xf32>,
      %cst_89 = arith.constant 0.000000e+00 : f32
      %184 = vector.broadcast %cst_89 : f32 to vector<1x1x4xf32>
      %c0_90 = arith.constant 0 : index
      %c0_91 = arith.constant 0 : index
      %c0_92 = arith.constant 0 : index
      %185 = vector.load %arg6[%c0_90, %c0_91, %c0_92] : memref<1x1x4xf32, #tpu.memory_space<vmem>>, vector<1x1x4xf32>
      tpu.vector_store %arg6[%c0_90, %c0_91, %c0_92], %184 {strides = array<i32>} : memref<1x1x4xf32, #tpu.memory_space<vmem>>, vector<1x1x4xf32>,
    } else {
    }
    %c0 = arith.constant 0 : index
    %c0_1 = arith.constant 0 : index
    %c0_2 = arith.constant 0 : index
    %c0_3 = arith.constant 0 : index
    %3 = vector.load %arg3[%c0, %c0_1, %c0_2, %c0_3] : memref<1x4x32x128xf32, #tpu.memory_space<vmem>>, vector<1x1x32x128xf32>
    %4 = vector.shape_cast %3 : vector<1x1x32x128xf32> to vector<32x128xf32>
    %c0_4 = arith.constant 0 : index
    %c1 = arith.constant 1 : index
    %c0_5 = arith.constant 0 : index
    %c0_6 = arith.constant 0 : index
    %5 = vector.load %arg3[%c0_4, %c1, %c0_5, %c0_6] : memref<1x4x32x128xf32, #tpu.memory_space<vmem>>, vector<1x1x32x128xf32>
    %6 = vector.shape_cast %5 : vector<1x1x32x128xf32> to vector<32x128xf32>
    %c0_7 = arith.constant 0 : index
    %c2 = arith.constant 2 : index
    %c0_8 = arith.constant 0 : index
    %c0_9 = arith.constant 0 : index
    %7 = vector.load %arg3[%c0_7, %c2, %c0_8, %c0_9] : memref<1x4x32x128xf32, #tpu.memory_space<vmem>>, vector<1x1x32x128xf32>
    %8 = vector.shape_cast %7 : vector<1x1x32x128xf32> to vector<32x128xf32>
    %c0_10 = arith.constant 0 : index
    %c3 = arith.constant 3 : index
    %c0_11 = arith.constant 0 : index
    %c0_12 = arith.constant 0 : index
    %9 = vector.load %arg3[%c0_10, %c3, %c0_11, %c0_12] : memref<1x4x32x128xf32, #tpu.memory_space<vmem>>, vector<1x1x32x128xf32>
    %10 = vector.shape_cast %9 : vector<1x1x32x128xf32> to vector<32x128xf32>
    %11 = arith.maximumf %4, %6 : vector<32x128xf32>
    %12 = arith.maximumf %11, %8 : vector<32x128xf32>
    %13 = arith.maximumf %12, %10 : vector<32x128xf32>
    %14 = arith.subf %4, %13 : vector<32x128xf32>
    %15 = math.exp %14 : vector<32x128xf32>
    %16 = arith.subf %6, %13 : vector<32x128xf32>
    %17 = math.exp %16 : vector<32x128xf32>
    %18 = arith.subf %8, %13 : vector<32x128xf32>
    %19 = math.exp %18 : vector<32x128xf32>
    %20 = arith.subf %10, %13 : vector<32x128xf32>
    %21 = math.exp %20 : vector<32x128xf32>
    %22 = arith.addf %15, %17 : vector<32x128xf32>
    %23 = arith.addf %22, %19 : vector<32x128xf32>
    %24 = arith.addf %23, %21 : vector<32x128xf32>
    %25 = tpu.reciprocal %24 : vector<32x128xf32> -> vector<32x128xf32>
    %c0_13 = arith.constant 0 : index
    %c0_14 = arith.constant 0 : index
    %c0_15 = arith.constant 0 : index
    %26 = vector.load %arg2[%c0_13, %c0_14, %c0_15] : memref<1x32x128xi8, #tpu.memory_space<vmem>>, vector<1x32x128xi8>
    %27 = vector.shape_cast %26 : vector<1x32x128xi8> to vector<32x128xi8>
    %28 = arith.extsi %27 : vector<32x128xi8> to vector<32x128xi32>
    %29 = tpu.iota {dimensions = array<i32: 0>} : vector<4x128xi32>
    %cst = arith.constant 0.000000e+00 : f32
    %30 = vector.broadcast %cst : f32 to vector<4x128xf32>
    %cst_16 = arith.constant 0.000000e+00 : f32
    %31 = vector.broadcast %cst_16 : f32 to vector<4x128xf32>
    %cst_17 = arith.constant 0.000000e+00 : f32
    %32 = vector.broadcast %cst_17 : f32 to vector<4x128xf32>
    %33 = arith.mulf %15, %25 : vector<32x128xf32>
    %c0_i32_18 = arith.constant 0 : i32
    %34 = vector.broadcast %c0_i32_18 : i32 to vector<32x128xi32>
    %35 = arith.cmpi eq, %28, %34 : vector<32x128xi32>
    %cst_19 = arith.constant 1.000000e+00 : f32
    %cst_20 = arith.constant 0.000000e+00 : f32
    %36 = vector.broadcast %cst_19 : f32 to vector<32x128xf32>
    %37 = vector.broadcast %cst_20 : f32 to vector<32x128xf32>
    %38 = arith.select %35, %36, %37 : vector<32x128xi1>, vector<32x128xf32>
    %cst_21 = arith.constant dense<0.000000e+00> : vector<128xf32>
    %39 = vector.multi_reduction <add>, %38, %cst_21 [0] : vector<32x128xf32> to vector<128xf32>
    %40 = vector.shape_cast %39 : vector<128xf32> to vector<1x128xf32>
    %cst_22 = arith.constant 0.000000e+00 : f32
    %41 = vector.broadcast %cst_22 : f32 to vector<32x128xf32>
    %42 = arith.select %35, %33, %41 : vector<32x128xi1>, vector<32x128xf32>
    %cst_23 = arith.constant dense<0.000000e+00> : vector<128xf32>
    %43 = vector.multi_reduction <add>, %42, %cst_23 [0] : vector<32x128xf32> to vector<128xf32>
    %44 = vector.shape_cast %43 : vector<128xf32> to vector<1x128xf32>
    %45 = arith.mulf %33, %33 : vector<32x128xf32>
    %cst_24 = arith.constant dense<0.000000e+00> : vector<128xf32>
    %46 = vector.multi_reduction <add>, %45, %cst_24 [0] : vector<32x128xf32> to vector<128xf32>
    %47 = vector.shape_cast %46 : vector<128xf32> to vector<1x128xf32>
    %c0_i32_25 = arith.constant 0 : i32
    %48 = vector.broadcast %c0_i32_25 : i32 to vector<4x128xi32>
    %49 = arith.cmpi eq, %29, %48 : vector<4x128xi32>
    %cst_26 = arith.constant 0.000000e+00 : f32
    %50 = vector.shape_cast %40 : vector<1x128xf32> to vector<1x128xf32>
    %51 = vector.broadcast %50 : vector<1x128xf32> to vector<4x128xf32>
    %52 = vector.broadcast %cst_26 : f32 to vector<4x128xf32>
    %53 = arith.select %49, %51, %52 : vector<4x128xi1>, vector<4x128xf32>
    %54 = arith.addf %30, %53 : vector<4x128xf32>
    %cst_27 = arith.constant 0.000000e+00 : f32
    %55 = vector.shape_cast %44 : vector<1x128xf32> to vector<1x128xf32>
    %56 = vector.broadcast %55 : vector<1x128xf32> to vector<4x128xf32>
    %57 = vector.broadcast %cst_27 : f32 to vector<4x128xf32>
    %58 = arith.select %49, %56, %57 : vector<4x128xi1>, vector<4x128xf32>
    %59 = arith.addf %31, %58 : vector<4x128xf32>
    %cst_28 = arith.constant 0.000000e+00 : f32
    %60 = vector.shape_cast %47 : vector<1x128xf32> to vector<1x128xf32>
    %61 = vector.broadcast %60 : vector<1x128xf32> to vector<4x128xf32>
    %62 = vector.broadcast %cst_28 : f32 to vector<4x128xf32>
    %63 = arith.select %49, %61, %62 : vector<4x128xi1>, vector<4x128xf32>
    %64 = arith.addf %32, %63 : vector<4x128xf32>
    %65 = arith.mulf %17, %25 : vector<32x128xf32>
    %c1_i32 = arith.constant 1 : i32
    %66 = vector.broadcast %c1_i32 : i32 to vector<32x128xi32>
    %67 = arith.cmpi eq, %28, %66 : vector<32x128xi32>
    %cst_29 = arith.constant 1.000000e+00 : f32
    %cst_30 = arith.constant 0.000000e+00 : f32
    %68 = vector.broadcast %cst_29 : f32 to vector<32x128xf32>
    %69 = vector.broadcast %cst_30 : f32 to vector<32x128xf32>
    %70 = arith.select %67, %68, %69 : vector<32x128xi1>, vector<32x128xf32>
    %cst_31 = arith.constant dense<0.000000e+00> : vector<128xf32>
    %71 = vector.multi_reduction <add>, %70, %cst_31 [0] : vector<32x128xf32> to vector<128xf32>
    %72 = vector.shape_cast %71 : vector<128xf32> to vector<1x128xf32>
    %cst_32 = arith.constant 0.000000e+00 : f32
    %73 = vector.broadcast %cst_32 : f32 to vector<32x128xf32>
    %74 = arith.select %67, %65, %73 : vector<32x128xi1>, vector<32x128xf32>
    %cst_33 = arith.constant dense<0.000000e+00> : vector<128xf32>
    %75 = vector.multi_reduction <add>, %74, %cst_33 [0] : vector<32x128xf32> to vector<128xf32>
    %76 = vector.shape_cast %75 : vector<128xf32> to vector<1x128xf32>
    %77 = arith.mulf %65, %65 : vector<32x128xf32>
    %cst_34 = arith.constant dense<0.000000e+00> : vector<128xf32>
    %78 = vector.multi_reduction <add>, %77, %cst_34 [0] : vector<32x128xf32> to vector<128xf32>
    %79 = vector.shape_cast %78 : vector<128xf32> to vector<1x128xf32>
    %c1_i32_35 = arith.constant 1 : i32
    %80 = vector.broadcast %c1_i32_35 : i32 to vector<4x128xi32>
    %81 = arith.cmpi eq, %29, %80 : vector<4x128xi32>
    %cst_36 = arith.constant 0.000000e+00 : f32
    %82 = vector.shape_cast %72 : vector<1x128xf32> to vector<1x128xf32>
    %83 = vector.broadcast %82 : vector<1x128xf32> to vector<4x128xf32>
    %84 = vector.broadcast %cst_36 : f32 to vector<4x128xf32>
    %85 = arith.select %81, %83, %84 : vector<4x128xi1>, vector<4x128xf32>
    %86 = arith.addf %54, %85 : vector<4x128xf32>
    %cst_37 = arith.constant 0.000000e+00 : f32
    %87 = vector.shape_cast %76 : vector<1x128xf32> to vector<1x128xf32>
    %88 = vector.broadcast %87 : vector<1x128xf32> to vector<4x128xf32>
    %89 = vector.broadcast %cst_37 : f32 to vector<4x128xf32>
    %90 = arith.select %81, %88, %89 : vector<4x128xi1>, vector<4x128xf32>
    %91 = arith.addf %59, %90 : vector<4x128xf32>
    %cst_38 = arith.constant 0.000000e+00 : f32
    %92 = vector.shape_cast %79 : vector<1x128xf32> to vector<1x128xf32>
    %93 = vector.broadcast %92 : vector<1x128xf32> to vector<4x128xf32>
    %94 = vector.broadcast %cst_38 : f32 to vector<4x128xf32>
    %95 = arith.select %81, %93, %94 : vector<4x128xi1>, vector<4x128xf32>
    %96 = arith.addf %64, %95 : vector<4x128xf32>
    %97 = arith.mulf %19, %25 : vector<32x128xf32>
    %c2_i32 = arith.constant 2 : i32
    %98 = vector.broadcast %c2_i32 : i32 to vector<32x128xi32>
    %99 = arith.cmpi eq, %28, %98 : vector<32x128xi32>
    %cst_39 = arith.constant 1.000000e+00 : f32
    %cst_40 = arith.constant 0.000000e+00 : f32
    %100 = vector.broadcast %cst_39 : f32 to vector<32x128xf32>
    %101 = vector.broadcast %cst_40 : f32 to vector<32x128xf32>
    %102 = arith.select %99, %100, %101 : vector<32x128xi1>, vector<32x128xf32>
    %cst_41 = arith.constant dense<0.000000e+00> : vector<128xf32>
    %103 = vector.multi_reduction <add>, %102, %cst_41 [0] : vector<32x128xf32> to vector<128xf32>
    %104 = vector.shape_cast %103 : vector<128xf32> to vector<1x128xf32>
    %cst_42 = arith.constant 0.000000e+00 : f32
    %105 = vector.broadcast %cst_42 : f32 to vector<32x128xf32>
    %106 = arith.select %99, %97, %105 : vector<32x128xi1>, vector<32x128xf32>
    %cst_43 = arith.constant dense<0.000000e+00> : vector<128xf32>
    %107 = vector.multi_reduction <add>, %106, %cst_43 [0] : vector<32x128xf32> to vector<128xf32>
    %108 = vector.shape_cast %107 : vector<128xf32> to vector<1x128xf32>
    %109 = arith.mulf %97, %97 : vector<32x128xf32>
    %cst_44 = arith.constant dense<0.000000e+00> : vector<128xf32>
    %110 = vector.multi_reduction <add>, %109, %cst_44 [0] : vector<32x128xf32> to vector<128xf32>
    %111 = vector.shape_cast %110 : vector<128xf32> to vector<1x128xf32>
    %c2_i32_45 = arith.constant 2 : i32
    %112 = vector.broadcast %c2_i32_45 : i32 to vector<4x128xi32>
    %113 = arith.cmpi eq, %29, %112 : vector<4x128xi32>
    %cst_46 = arith.constant 0.000000e+00 : f32
    %114 = vector.shape_cast %104 : vector<1x128xf32> to vector<1x128xf32>
    %115 = vector.broadcast %114 : vector<1x128xf32> to vector<4x128xf32>
    %116 = vector.broadcast %cst_46 : f32 to vector<4x128xf32>
    %117 = arith.select %113, %115, %116 : vector<4x128xi1>, vector<4x128xf32>
    %118 = arith.addf %86, %117 : vector<4x128xf32>
    %cst_47 = arith.constant 0.000000e+00 : f32
    %119 = vector.shape_cast %108 : vector<1x128xf32> to vector<1x128xf32>
    %120 = vector.broadcast %119 : vector<1x128xf32> to vector<4x128xf32>
    %121 = vector.broadcast %cst_47 : f32 to vector<4x128xf32>
    %122 = arith.select %113, %120, %121 : vector<4x128xi1>, vector<4x128xf32>
    %123 = arith.addf %91, %122 : vector<4x128xf32>
    %cst_48 = arith.constant 0.000000e+00 : f32
    %124 = vector.shape_cast %111 : vector<1x128xf32> to vector<1x128xf32>
    %125 = vector.broadcast %124 : vector<1x128xf32> to vector<4x128xf32>
    %126 = vector.broadcast %cst_48 : f32 to vector<4x128xf32>
    %127 = arith.select %113, %125, %126 : vector<4x128xi1>, vector<4x128xf32>
    %128 = arith.addf %96, %127 : vector<4x128xf32>
    %129 = arith.mulf %21, %25 : vector<32x128xf32>
    %c3_i32 = arith.constant 3 : i32
    %130 = vector.broadcast %c3_i32 : i32 to vector<32x128xi32>
    %131 = arith.cmpi eq, %28, %130 : vector<32x128xi32>
    %cst_49 = arith.constant 1.000000e+00 : f32
    %cst_50 = arith.constant 0.000000e+00 : f32
    %132 = vector.broadcast %cst_49 : f32 to vector<32x128xf32>
    %133 = vector.broadcast %cst_50 : f32 to vector<32x128xf32>
    %134 = arith.select %131, %132, %133 : vector<32x128xi1>, vector<32x128xf32>
    %cst_51 = arith.constant dense<0.000000e+00> : vector<128xf32>
    %135 = vector.multi_reduction <add>, %134, %cst_51 [0] : vector<32x128xf32> to vector<128xf32>
    %136 = vector.shape_cast %135 : vector<128xf32> to vector<1x128xf32>
    %cst_52 = arith.constant 0.000000e+00 : f32
    %137 = vector.broadcast %cst_52 : f32 to vector<32x128xf32>
    %138 = arith.select %131, %129, %137 : vector<32x128xi1>, vector<32x128xf32>
    %cst_53 = arith.constant dense<0.000000e+00> : vector<128xf32>
    %139 = vector.multi_reduction <add>, %138, %cst_53 [0] : vector<32x128xf32> to vector<128xf32>
    %140 = vector.shape_cast %139 : vector<128xf32> to vector<1x128xf32>
    %141 = arith.mulf %129, %129 : vector<32x128xf32>
    %cst_54 = arith.constant dense<0.000000e+00> : vector<128xf32>
    %142 = vector.multi_reduction <add>, %141, %cst_54 [0] : vector<32x128xf32> to vector<128xf32>
    %143 = vector.shape_cast %142 : vector<128xf32> to vector<1x128xf32>
    %c3_i32_55 = arith.constant 3 : i32
    %144 = vector.broadcast %c3_i32_55 : i32 to vector<4x128xi32>
    %145 = arith.cmpi eq, %29, %144 : vector<4x128xi32>
    %cst_56 = arith.constant 0.000000e+00 : f32
    %146 = vector.shape_cast %136 : vector<1x128xf32> to vector<1x128xf32>
    %147 = vector.broadcast %146 : vector<1x128xf32> to vector<4x128xf32>
    %148 = vector.broadcast %cst_56 : f32 to vector<4x128xf32>
    %149 = arith.select %145, %147, %148 : vector<4x128xi1>, vector<4x128xf32>
    %150 = arith.addf %118, %149 : vector<4x128xf32>
    %cst_57 = arith.constant 0.000000e+00 : f32
    %151 = vector.shape_cast %140 : vector<1x128xf32> to vector<1x128xf32>
    %152 = vector.broadcast %151 : vector<1x128xf32> to vector<4x128xf32>
    %153 = vector.broadcast %cst_57 : f32 to vector<4x128xf32>
    %154 = arith.select %145, %152, %153 : vector<4x128xi1>, vector<4x128xf32>
    %155 = arith.addf %123, %154 : vector<4x128xf32>
    %cst_58 = arith.constant 0.000000e+00 : f32
    %156 = vector.shape_cast %143 : vector<1x128xf32> to vector<1x128xf32>
    %157 = vector.broadcast %156 : vector<1x128xf32> to vector<4x128xf32>
    %158 = vector.broadcast %cst_58 : f32 to vector<4x128xf32>
    %159 = arith.select %145, %157, %158 : vector<4x128xi1>, vector<4x128xf32>
    %160 = arith.addf %128, %159 : vector<4x128xf32>
    %cst_59 = arith.constant dense<0.000000e+00> : vector<4xf32>
    %161 = vector.multi_reduction <add>, %150, %cst_59 [1] : vector<4x128xf32> to vector<4xf32>
    %cst_60 = arith.constant dense<0.000000e+00> : vector<4xf32>
    %162 = vector.multi_reduction <add>, %155, %cst_60 [1] : vector<4x128xf32> to vector<4xf32>
    %cst_61 = arith.constant dense<0.000000e+00> : vector<4xf32>
    %163 = vector.multi_reduction <add>, %160, %cst_61 [1] : vector<4x128xf32> to vector<4xf32>
    %cst_62 = arith.constant 2.000000e+00 : f32
    %164 = vector.broadcast %cst_62 : f32 to vector<4xf32>
    %165 = arith.mulf %164, %162 : vector<4xf32>
    %166 = arith.subf %161, %165 : vector<4xf32>
    %167 = arith.addf %166, %163 : vector<4xf32>
    %c0_63 = arith.constant 0 : index
    %c0_64 = arith.constant 0 : index
    %c0_65 = arith.constant 0 : index
    %168 = vector.load %arg4[%c0_63, %c0_64, %c0_65] : memref<1x1x4xf32, #tpu.memory_space<vmem>>, vector<1x1x4xf32>
    %169 = vector.shape_cast %167 : vector<4xf32> to vector<1x1x4xf32>
    %170 = arith.addf %168, %169 : vector<1x1x4xf32>
    %c0_66 = arith.constant 0 : index
    %c0_67 = arith.constant 0 : index
    %c0_68 = arith.constant 0 : index
    %171 = vector.load %arg4[%c0_66, %c0_67, %c0_68] : memref<1x1x4xf32, #tpu.memory_space<vmem>>, vector<1x1x4xf32>
    tpu.vector_store %arg4[%c0_66, %c0_67, %c0_68], %170 {strides = array<i32>} : memref<1x1x4xf32, #tpu.memory_space<vmem>>, vector<1x1x4xf32>,
    %c0_69 = arith.constant 0 : index
    %c0_70 = arith.constant 0 : index
    %c0_71 = arith.constant 0 : index
    %172 = vector.load %arg5[%c0_69, %c0_70, %c0_71] : memref<1x1x4xf32, #tpu.memory_space<vmem>>, vector<1x1x4xf32>
    %173 = vector.shape_cast %161 : vector<4xf32> to vector<1x1x4xf32>
    %174 = arith.addf %172, %173 : vector<1x1x4xf32>
    %c0_72 = arith.constant 0 : index
    %c0_73 = arith.constant 0 : index
    %c0_74 = arith.constant 0 : index
    %175 = vector.load %arg5[%c0_72, %c0_73, %c0_74] : memref<1x1x4xf32, #tpu.memory_space<vmem>>, vector<1x1x4xf32>
    tpu.vector_store %arg5[%c0_72, %c0_73, %c0_74], %174 {strides = array<i32>} : memref<1x1x4xf32, #tpu.memory_space<vmem>>, vector<1x1x4xf32>,
    %c0_75 = arith.constant 0 : index
    %c0_76 = arith.constant 0 : index
    %c0_77 = arith.constant 0 : index
    %176 = vector.load %arg6[%c0_75, %c0_76, %c0_77] : memref<1x1x4xf32, #tpu.memory_space<vmem>>, vector<1x1x4xf32>
    %177 = vector.shape_cast %163 : vector<4xf32> to vector<1x1x4xf32>
    %178 = arith.addf %176, %177 : vector<1x1x4xf32>
    %c0_78 = arith.constant 0 : index
    %c0_79 = arith.constant 0 : index
    %c0_80 = arith.constant 0 : index
    %179 = vector.load %arg6[%c0_78, %c0_79, %c0_80] : memref<1x1x4xf32, #tpu.memory_space<vmem>>, vector<1x1x4xf32>
    tpu.vector_store %arg6[%c0_78, %c0_79, %c0_80], %178 {strides = array<i32>} : memref<1x1x4xf32, #tpu.memory_space<vmem>>, vector<1x1x4xf32>,
    return
  }
  func.func @transform_0(%arg0: i32, %arg1: i32) -> (i32, i32, i32) {
    %c0_i32 = arith.constant 0 : i32
    %c0_i32_0 = arith.constant 0 : i32
    return %arg0, %arg1, %c0_i32 : i32, i32, i32
  }
  func.func @transform_1(%arg0: i32, %arg1: i32) -> (i32, i32, i32, i32) {
    %c0_i32 = arith.constant 0 : i32
    %c0_i32_0 = arith.constant 0 : i32
    %c0_i32_1 = arith.constant 0 : i32
    return %arg0, %c0_i32, %arg1, %c0_i32_0 : i32, i32, i32, i32
  }
  func.func @transform_2(%arg0: i32, %arg1: i32) -> (i32, i32, i32) {
    %c0_i32 = arith.constant 0 : i32
    %c0_i32_0 = arith.constant 0 : i32
    %c0_i32_1 = arith.constant 0 : i32
    return %arg0, %c0_i32, %c0_i32_0 : i32, i32, i32
  }
  func.func @transform_3(%arg0: i32, %arg1: i32) -> (i32, i32, i32) {
    %c0_i32 = arith.constant 0 : i32
    %c0_i32_0 = arith.constant 0 : i32
    %c0_i32_1 = arith.constant 0 : i32
    return %arg0, %c0_i32, %c0_i32_0 : i32, i32, i32
  }
  func.func @transform_4(%arg0: i32, %arg1: i32) -> (i32, i32, i32) {
    %c0_i32 = arith.constant 0 : i32
    %c0_i32_0 = arith.constant 0 : i32
    %c0_i32_1 = arith.constant 0 : i32
    return %arg0, %c0_i32, %c0_i32_0 : i32, i32, i32
  }
}

</mosaic_0001>

<bundles_post_ra>
// kernel: weighted_dice_loss.1
= control target key start
LH: loop header
LB: loop body
LE: loop exit
PB: predicated region body
PF: predicated region fallthrough
CT: control target
= control target key end

     0   :  { %s1077_s15 = smov 0   ;;  %s1079_s16 = smov 0   ;;  %s1391_s0 = inlined_call_operand.vmem [shape: s8[2,32,128], index: 0, kind: input, shape index: {}]   ;;  %s1392_s1 = inlined_call_operand.vmem [shape: f32[2,4,32,128], index: 1, kind: input, shape index: {}]   ;;  %s1393_s2 = inlined_call_operand.vmem [shape: f32[2,1,4], index: 2, kind: output, shape index: {0}]   ;;  %s1394_s3 = inlined_call_operand.vmem [shape: f32[2,1,4], index: 3, kind: output, shape index: {1}]   ;;  %s1395_s4 = inlined_call_operand.vmem [shape: f32[2,1,4], index: 4, kind: output, shape index: {2}]  }
   0x1   :  { %s1081_s17 = smov 0  }
   0x2 LB: > { %s27_s18 = sadd.s32 1, %s1043_s16  ;;  %p937_p0 = scmp.ge.s32.totalorder %s1047_s17, 1  ;;  %s1047_s17 = sphi %s1081_s17, %s15_s17   ;;  %s1043_s16 = sphi %s1079_s16, %s1403_s16   ;;  %s1039_s15 = sphi %s1077_s15, %s1402_s15  }
   0x3   : > { %p29_p1 = scmp.ge.s32.totalorder %s27_s18, 2  ;;  %p200_p2 = scmp.lt.s32.totalorder %s1047_s17, 3 }
   0x5   : > { %s1405_s18 = smov (%p29_p1, %s27_s18), 0  ;;  %p201_p3 = pnand %p937_p0, %p200_p2 }
   0x6   : > { %p241_p4 = scmp.lt.s32.totalorder (!%p201_p3), %s1039_s15, 1 }
   0x7   : > { %204 = sbr.rel (%p201_p3) target bundleno = 409 (0x199), region = 28 }
   0xe   : > { %s1407_s15 = smov (!%p241_p4, %s1039_s15), 1 }
   0xf   : > { %s955_s19 = sshll.u32 %s1407_s15, 7  ;;  %s938_s20 = sshll.u32 %s1407_s15, 3 }
  0x10   : > { %s256_s23 = scalar_lea.vmem %s1392_s1, %s955_s19  ;;  %s247_s26 = scalar_lea.vmem %s1391_s0, %s938_s20 }
  0x11   : > { %v275_v0 = vld [vmem:[%s256_s23] sm:$0xff]  ;;  %v276_v1 = vld [vmem:[%s256_s23 + $0x8] sm:$0xff]  ;;  %v277_v2 = vld [vmem:[%s256_s23 + $0x10] sm:$0xff]  ;;  %s1336_s29 = scalar_lea.vmem %s1394_s3, %s1407_s15  ;;  %s260_s6 = scalar_lea.vmem %s1393_s2, %s1407_s15 }
  0x12   : > { %v278_v3 = vld [vmem:[%s256_s23 + $0x18] sm:$0xff]  ;;  %v941_v4 = vld [vmem:[%s256_s23 + $0x20] sm:$0xff]  ;;  %v942_v5 = vld [vmem:[%s256_s23 + $0x28] sm:$0xff]  ;;  %s266_s9 = scalar_lea.vmem %s1395_s4, %s1407_s15 }
  0x13   : > { %v943_v6 = vld [vmem:[%s256_s23 + $0x30] sm:$0xff]  ;;  %v944_v7 = vld [vmem:[%s256_s23 + $0x38] sm:$0xff]  ;;  %v945_v8 = vld [vmem:[%s256_s23 + $0x40] sm:$0xff]  ;;  %v294_v9 = vmax.f32 %v275_v0, %v941_v4  ;;  %v295_v10 = vmax.f32 %v276_v1, %v942_v5 }
  0x14   : > { %v946_v11 = vld [vmem:[%s256_s23 + $0x48] sm:$0xff]  ;;  %v947_v12 = vld [vmem:[%s256_s23 + $0x50] sm:$0xff]  ;;  %v948_v13 = vld [vmem:[%s256_s23 + $0x58] sm:$0xff]  ;;  %v296_v14 = vmax.f32 %v277_v2, %v943_v6  ;;  %v297_v15 = vmax.f32 %v278_v3, %v944_v7 }
  0x15   : > { %v949_v16 = vld [vmem:[%s256_s23 + $0x60] sm:$0xff]  ;;  %v950_v17 = vld [vmem:[%s256_s23 + $0x68] sm:$0xff]  ;;  %v951_v18 = vld [vmem:[%s256_s23 + $0x70] sm:$0xff]  ;;  %v298_v19 = vmax.f32 %v294_v9, %v945_v8  ;;  %v299_v20 = vmax.f32 %v295_v10, %v946_v11 }
  0x16   : > { %v952_v21 = vld [vmem:[%s256_s23 + $0x78] sm:$0xff]  ;;  %v300_v22 = vmax.f32 %v296_v14, %v947_v12  ;;  %v301_v23 = vmax.f32 %v297_v15, %v948_v13  ;;  %v370_v24 = vld [vmem:[%s247_s26] sm:$0xff] }
  0x17   : > { %v302_v25 = vmax.f32 %v298_v19, %v949_v16  ;;  %v303_v26 = vmax.f32 %v299_v20, %v950_v17  ;;  %v1105_v27 = vunpack.c.0.s8 %v370_v24  ;;  %v1107_v30 = vunpack.c.1.s8 %v370_v24 }
  0x18   : > { %v304_v28 = vmax.f32 %v300_v22, %v951_v18  ;;  %v305_v29 = vmax.f32 %v301_v23, %v952_v21  ;;  %v1109_v31 = vunpack.c.2.s8 %v370_v24  ;;  %v1111_v43 = vunpack.c.3.s8 %v370_v24 }
  0x19   : > { %v306_v32 = vsub.f32 %v275_v0, %v302_v25  ;;  %v307_v33 = vsub.f32 %v276_v1, %v303_v26  ;;  %v318_v34 = vsub.f32 %v941_v4, %v302_v25  ;;  %v319_v35 = vsub.f32 %v942_v5, %v303_v26 }
  0x1a   : > { %v308_v36 = vsub.f32 %v277_v2, %v304_v28  ;;  %v309_v37 = vsub.f32 %v278_v3, %v305_v29  ;;  %v320_v38 = vsub.f32 %v943_v6, %v304_v28  ;;  %v321_v39 = vsub.f32 %v944_v7, %v305_v29 }
  0x1b   : > { %v310_v40 = vmul.f32 1.442695, %v306_v32  ;;  %v312_v41 = vmul.f32 1.442695, %v307_v33  ;;  %v330_v42 = vsub.f32 %v945_v8, %v302_v25  ;;  %v322_v46 = vmul.f32 1.442695, %v318_v34 }
  0x1c   : > { %v314_v44 = vmul.f32 1.442695, %v308_v36  ;;  %v316_v45 = vmul.f32 1.442695, %v309_v37  ;;  %v331_v47 = vsub.f32 %v946_v11, %v303_v26  ;;  %v324_v48 = vmul.f32 1.442695, %v319_v35 }
  0x1d   : > { %985 = vpow2.f32 %v310_v40  ;;  %v326_v49 = vmul.f32 1.442695, %v320_v38  ;;  %v332_v50 = vsub.f32 %v947_v12, %v304_v28  ;;  %v328_v51 = vmul.f32 1.442695, %v321_v39 }
  0x1e   : > { %987 = vpow2.f32 %v312_v41  ;;  %v333_v52 = vsub.f32 %v948_v13, %v305_v29  ;;  %v334_v53 = vmul.f32 1.442695, %v330_v42  ;;  %v336_v54 = vmul.f32 1.442695, %v331_v47 }
  0x1f   : > { %989 = vpow2.f32 %v314_v44  ;;  %v342_v55 = vsub.f32 %v949_v16, %v302_v25  ;;  %v343_v56 = vsub.f32 %v950_v17, %v303_v26  ;;  %v338_v57 = vmul.f32 1.442695, %v332_v50 }
  0x20   : > { %991 = vpow2.f32 %v316_v45  ;;  %v344_v58 = vsub.f32 %v951_v18, %v304_v28  ;;  %v345_v59 = vsub.f32 %v952_v21, %v305_v29  ;;  %v340_v60 = vmul.f32 1.442695, %v333_v52 }
  0x21   : > { %993 = vpow2.f32 %v322_v46  ;;  %v346_v61 = vmul.f32 1.442695, %v342_v55  ;;  %v348_v62 = vmul.f32 1.442695, %v343_v56  ;;  %vm381_vm0 = vcmp.eq.s32.totalorder %v1105_v27, 0 }
  0x22   : > { %995 = vpow2.f32 %v324_v48  ;;  %v350_v63 = vmul.f32 1.442695, %v344_v58  ;;  %v352_v0 = vmul.f32 1.442695, %v345_v59  ;;  %vm382_vm1 = vcmp.eq.s32.totalorder %v1107_v30, 0 }
  0x23   : > { %997 = vpow2.f32 %v326_v49  ;;  %vm383_vm2 = vcmp.eq.s32.totalorder %v1109_v31, 0  ;;  %vm384_vm3 = vcmp.eq.s32.totalorder %v1111_v43, 0  ;;  %vm435_vm4 = vcmp.eq.s32.totalorder %v1105_v27, 1 }
  0x24   : > { %999 = vpow2.f32 %v328_v51  ;;  %vm436_vm5 = vcmp.eq.s32.totalorder %v1107_v30, 1  ;;  %vm437_vm6 = vcmp.eq.s32.totalorder %v1109_v31, 1  ;;  %vm438_vm7 = vcmp.eq.s32.totalorder %v1111_v43, 1 }
  0x25   : > { %1001 = vpow2.f32 %v334_v53  ;;  %vm489_vm8 = vcmp.eq.s32.totalorder %v1105_v27, 2  ;;  %vm490_vm9 = vcmp.eq.s32.totalorder %v1107_v30, 2  ;;  %vm491_vm10 = vcmp.eq.s32.totalorder %v1109_v31, 2 }
  0x26   : > { %1003 = vpow2.f32 %v336_v54  ;;  %vm492_vm11 = vcmp.eq.s32.totalorder %v1111_v43, 2  ;;  %vm543_vm12 = vcmp.eq.s32.totalorder %v1105_v27, 3  ;;  %vm1398_vm13 = vcmp.eq.s32.totalorder %v1107_v30, 3 }
  0x27   : > { %v1126_v1 = vpop.eup %985  ;;  %1005 = vpow2.f32 %v338_v57  ;;  %vm1397_vm14 = vcmp.eq.s32.totalorder %v1109_v31, 3  ;;  %v1049_v2 = vmov 0.0   ;;  %vm1396_vm15 = vcmp.eq.s32.totalorder %v1111_v43, 3 }
  0x28   : > { %v385_v3 = vsel %vm381_vm0, 1.0, %v1049_v2  ;;  %v1133_v4 = vpop.eup %987  ;;  %1007 = vpow2.f32 %v340_v60  ;;  %v386_v5 = vsel %vm382_vm1, 1.0, %v1049_v2  ;;  %v387_v6 = vsel %vm383_vm2, 1.0, %v1049_v2 }
  0x29   : > { %v388_v7 = vsel %vm384_vm3, 1.0, %v1049_v2  ;;  %v1144_v8 = vpop.eup %989  ;;  %1009 = vpow2.f32 %v346_v61  ;;  %v389_v9 = vadd.f32 %v386_v5, %v385_v3  ;;  %v439_v10 = vsel %vm435_vm4, 1.0, %v1049_v2 }
  0x2a   : > { %v440_v11 = vsel %vm436_vm5, 1.0, %v1049_v2  ;;  %v1152_v12 = vpop.eup %991  ;;  %1011 = vpow2.f32 %v348_v62  ;;  %v441_v13 = vsel %vm437_vm6, 1.0, %v1049_v2  ;;  %v442_v14 = vsel %vm438_vm7, 1.0, %v1049_v2 }
  0x2b   : > { %v443_v15 = vadd.f32 %v440_v11, %v439_v10  ;;  %v1160_v16 = vpop.eup %993  ;;  %1013 = vpow2.f32 %v350_v63  ;;  %v390_v17 = vadd.f32 %v389_v9, %v387_v6  ;;  %v493_v18 = vsel %vm489_vm8, 1.0, %v1049_v2 }
  0x2c   : > { %v494_v19 = vsel %vm490_vm9, 1.0, %v1049_v2  ;;  %v1168_v20 = vpop.eup %995  ;;  %1015 = vpow2.f32 %v352_v0  ;;  %v354_v21 = vadd.f32 %v1160_v16, %v1126_v1  ;;  %v495_v23 = vsel %vm491_vm10, 1.0, %v1049_v2 }
  0x2d   : > { %v444_v22 = vadd.f32 %v443_v15, %v441_v13  ;;  %v1175_v24 = vpop.eup %997  ;;  %v355_v25 = vadd.f32 %v1168_v20, %v1133_v4  ;;  %v391_v26 = vadd.f32 %v390_v17, %v388_v7  ;;  %v496_v28 = vsel %vm492_vm11, 1.0, %v1049_v2 }
  0x2e   : > { %v497_v29 = vadd.f32 %v494_v19, %v493_v18  ;;  %v1182_v32 = vpop.eup %999  ;;  %v356_v33 = vadd.f32 %v1175_v24, %v1144_v8  ;;  %v547_v35 = vsel %vm543_vm12, 1.0, %v1049_v2  ;;  %v548_v36 = vsel %vm1398_vm13, 1.0, %v1049_v2 }
  0x2f   : > { %v445_v34 = vadd.f32 %v444_v22, %v442_v14  ;;  %v1192_v37 = vpop.eup %1001  ;;  %v357_v38 = vadd.f32 %v1182_v32, %v1152_v12  ;;  %v392_v39 = vrot.slane %v391_v26, 4  ;;  %v549_v41 = vsel %vm1397_vm14, 1.0, %v1049_v2 }
  0x30   : > { %v498_v40 = vadd.f32 %v497_v29, %v495_v23  ;;  %v1199_v42 = vpop.eup %1003  ;;  %v358_v44 = vadd.f32 %v1192_v37, %v354_v21  ;;  %v551_v46 = vadd.f32 %v548_v36, %v547_v35  ;;  %v550_v51 = vsel %vm1396_vm15, 1.0, %v1049_v2 }
  0x31   : > { %v446_v45 = vrot.slane %v445_v34, 4  ;;  %v1203_v47 = vpop.eup %1005  ;;  %v359_v48 = vadd.f32 %v1199_v42, %v355_v25  ;;  %v393_v49 = vadd.f32 %v392_v39, %v391_v26  ;;  %v375_v62 = vlaneseq }
  0x32   : > { %v499_v50 = vadd.f32 %v498_v40, %v496_v28  ;;  %v1209_v52 = vpop.eup %1007  ;;  %v360_v53 = vadd.f32 %v1203_v47, %v356_v33  ;;  %v552_v55 = vadd.f32 %v551_v46, %v549_v41 }
  0x33   : > { %v447_v54 = vadd.f32 %v446_v45, %v445_v34  ;;  %v1010_v56 = vpop.eup %1009  ;;  %v361_v57 = vadd.f32 %v1209_v52, %v357_v38  ;;  %v394_v58 = vrot.slane %v393_v49, 2  ;;  %v1220_v18 = vshrl.u32 %v375_v62, 7 }
  0x34   : > { %v500_v59 = vrot.slane %v499_v50, 4  ;;  %v1012_v60 = vpop.eup %1011  ;;  %v362_v61 = vadd.f32 %v1010_v56, %v358_v44  ;;  %v553_v0 = vadd.f32 %v552_v55, %v550_v51 }
  0x35   : > { %v448_v63 = vrot.slane %v447_v54, 2  ;;  %v1213_v3 = vpop.eup %1013  ;;  %v363_v5 = vadd.f32 %v1012_v60, %v359_v48  ;;  %v395_v6 = vadd.f32 %v394_v58, %v393_v49  ;;  %vm424_vm15 = vcmp.eq.s32.totalorder %v1220_v18, 0 }
  0x36   : > { %v501_v7 = vadd.f32 %v500_v59, %v499_v50  ;;  %v1215_v9 = vpop.eup %1015  ;;  %v364_v10 = vadd.f32 %v1213_v3, %v360_v53  ;;  %1017 = vrcp.f32 %v362_v61  ;;  %v554_v13 = vrot.slane %v553_v0, 4 }
  0x37   : > { %v449_v11 = vadd.f32 %v448_v63, %v447_v54  ;;  %v365_v14 = vadd.f32 %v1215_v9, %v361_v57  ;;  %1019 = vrcp.f32 %v363_v5  ;;  %v396_v15 = vrot.slane %v395_v6, 1 }
  0x38   : > { %v502_v17 = vrot.slane %v501_v7, 2  ;;  %1021 = vrcp.f32 %v364_v10  ;;  %v555_v21 = vadd.f32 %v554_v13, %v553_v0  ;;  %vm478_vm14 = vcmp.eq.s32.totalorder %v1220_v18, 1 }
  0x39   : > { %v450_v19 = vrot.slane %v449_v11, 1  ;;  %1023 = vrcp.f32 %v365_v14  ;;  %v397_v22 = vadd.f32 %v396_v15, %v395_v6  ;;  %vm532_vm13 = vcmp.eq.s32.totalorder %v1220_v18, 2 }
  0x3a   : > { %v503_v23 = vadd.f32 %v502_v17, %v501_v7  ;;  %v556_v26 = vrot.slane %v555_v21, 2 }
  0x3b   : > { %v451_v25 = vadd.f32 %v450_v19, %v449_v11  ;;  %v425_v33 = vsel %vm424_vm15, %v397_v22, 0.0 }
  0x3c   : > { %v504_v28 = vrot.slane %v503_v23, 1  ;;  %v557_v29 = vadd.f32 %v556_v26, %v555_v21 }
  0x3d   : > { %v479_v34 = vsel %vm478_vm14, %v451_v25, 0.0 }
  0x3e   : > { %v505_v35 = vadd.f32 %v504_v28, %v503_v23  ;;  %v480_v38 = vadd.f32 %v479_v34, %v425_v33  ;;  %v558_v40 = vrot.slane %v557_v29, 1 }
  0x40   : > { %v1018_v36 = vpop.eup %1017  ;;  %v533_v39 = vsel %vm532_vm13, %v505_v35, 0.0 }
  0x41   : > { %v1020_v41 = vpop.eup %1019  ;;  %v377_v44 = vmul.f32 %v1018_v36, %v1126_v1  ;;  %v431_v45 = vmul.f32 %v1018_v36, %v1160_v16  ;;  %v1234_v46 = vmul.f32 %v1018_v36, %v1192_v37  ;;  %v1236_v48 = vmul.f32 %v1018_v36, %v1010_v56 }
  0x42   : > { %v1022_v49 = vpop.eup %1021  ;;  %v378_v50 = vmul.f32 %v1020_v41, %v1133_v4  ;;  %v432_v51 = vmul.f32 %v1020_v41, %v1168_v20  ;;  %v1241_v53 = vmul.f32 %v1020_v41, %v1199_v42  ;;  %v1243_v54 = vmul.f32 %v1020_v41, %v1012_v60 }
  0x43   : > { %v1024_v55 = vpop.eup %1023  ;;  %v379_v1 = vmul.f32 %v1022_v49, %v1144_v8  ;;  %v398_v16 = vsel %vm381_vm0, %v377_v44, 0.0  ;;  %v433_v37 = vmul.f32 %v1022_v49, %v1175_v24  ;;  %v452_v56 = vsel %vm435_vm4, %v431_v45, 0.0 }
  0x44   : > { %v380_v4 = vmul.f32 %v1024_v55, %v1152_v12  ;;  %v399_v20 = vsel %vm382_vm1, %v378_v50, 0.0  ;;  %v434_v42 = vmul.f32 %v1024_v55, %v1182_v32  ;;  %v453_v57 = vsel %vm436_vm5, %v432_v51, 0.0 }
  0x45   : > { %v400_v8 = vsel %vm383_vm2, %v379_v1, 0.0  ;;  %v402_v58 = vadd.f32 %v399_v20, %v398_v16  ;;  %v454_v24 = vsel %vm437_vm6, %v433_v37, 0.0  ;;  %v456_v59 = vadd.f32 %v453_v57, %v452_v56 }
  0x46   : > { %vm586_vm0 = vcmp.eq.s32.totalorder %v1220_v18, 3  ;;  %v401_v12 = vsel %vm384_vm3, %v380_v4, 0.0  ;;  %v455_v60 = vsel %vm438_vm7, %v434_v42, 0.0  ;;  %v487_v32 = vmul.f32 %v1022_v49, %v1203_v47 }
  0x47   : > { %v488_v61 = vmul.f32 %v1024_v55, %v1209_v52  ;;  %v403_v63 = vadd.f32 %v402_v58, %v400_v8  ;;  %v457_v0 = vadd.f32 %v456_v59, %v454_v24  ;;  %v506_v5 = vsel %vm489_vm8, %v1234_v46, 0.0 }
  0x48   : > { %v507_v6 = vsel %vm490_vm9, %v1241_v53, 0.0  ;;  %v508_v7 = vsel %vm491_vm10, %v487_v32, 0.0  ;;  %v1279_v47 = vmul.f32 %v1022_v49, %v1213_v3  ;;  %v1282_v14 = vmul.f32 %v1024_v55, %v1215_v9 }
  0x49   : > { %v509_v10 = vsel %vm492_vm11, %v488_v61, 0.0  ;;  %v510_v11 = vadd.f32 %v507_v6, %v506_v5  ;;  %v404_v52 = vadd.f32 %v403_v63, %v401_v12  ;;  %v458_v13 = vadd.f32 %v457_v0, %v455_v60 }
  0x4a   : > { %v560_v15 = vsel %vm543_vm12, %v1236_v48, 0.0  ;;  %vm1399_vm1 = vcmp.eq.s32.totalorder %v1107_v30, 3  ;;  %vm1400_vm2 = vcmp.eq.s32.totalorder %v1109_v31, 3  ;;  %v559_v3 = vadd.f32 %v558_v40, %v557_v29 }
  0x4b   : > { %v511_v17 = vadd.f32 %v510_v11, %v508_v7  ;;  %v561_v19 = vsel %vm1399_vm1, %v1243_v54, 0.0  ;;  %v562_v21 = vsel %vm1400_vm2, %v1279_v47, 0.0  ;;  %v405_v22 = vrot.slane %v404_v52, 4 }
  0x4c   : > { %v459_v23 = vrot.slane %v458_v13, 4  ;;  %v564_v25 = vadd.f32 %v561_v19, %v560_v15  ;;  %v1293_v26 = vadd.f32 %v533_v39, %v480_v38  ;;  %vm1401_vm3 = vcmp.eq.s32.totalorder %v1111_v43, 3 }
  0x4d   : > { %v512_v9 = vadd.f32 %v511_v17, %v509_v10  ;;  %v563_v27 = vsel %vm1401_vm3, %v1282_v14, 0.0  ;;  %v411_v28 = vmul.f32 %v377_v44, %v377_v44  ;;  %v412_v33 = vmul.f32 %v378_v50, %v378_v50 }
  0x4e   : > { %v406_v34 = vadd.f32 %v405_v22, %v404_v52  ;;  %v460_v30 = vadd.f32 %v459_v23, %v458_v13  ;;  %v565_v35 = vadd.f32 %v564_v25, %v562_v21  ;;  %v413_v36 = vmul.f32 %v379_v1, %v379_v1 }
  0x4f   : > { %v513_v41 = vrot.slane %v512_v9, 4  ;;  %v587_v31 = vsel %vm586_vm0, %v559_v3, 0.0  ;;  %v414_v29 = vmul.f32 %v380_v4, %v380_v4  ;;  %v415_v40 = vadd.f32 %v412_v33, %v411_v28 }
  0x50   : > { %v407_v49 = vrot.slane %v406_v34, 2  ;;  %v461_v38 = vrot.slane %v460_v30, 2  ;;  %v566_v39 = vadd.f32 %v565_v35, %v563_v27  ;;  %v465_v55 = vmul.f32 %v431_v45, %v431_v45 }
  0x51   : > { %v514_v16 = vadd.f32 %v513_v41, %v512_v9  ;;  %v416_v56 = vadd.f32 %v415_v40, %v413_v36  ;;  %v466_v43 = vmul.f32 %v432_v51, %v432_v51  ;;  %v467_v20 = vmul.f32 %v433_v37, %v433_v37 }
  0x52   : > { %v408_v44 = vadd.f32 %v407_v49, %v406_v34  ;;  %v462_v50 = vadd.f32 %v461_v38, %v460_v30  ;;  %v567_v57 = vrot.slane %v566_v39, 4  ;;  %v468_v8 = vmul.f32 %v434_v42, %v434_v42 }
  0x53   : > { %v515_v58 = vrot.slane %v514_v16, 2  ;;  %v417_v1 = vadd.f32 %v416_v56, %v414_v29  ;;  %v469_v24 = vadd.f32 %v466_v43, %v465_v55  ;;  %v519_v59 = vmul.f32 %v1234_v46, %v1234_v46 }
  0x54   : > { %v409_v4 = vrot.slane %v408_v44, 1  ;;  %v463_v12 = vrot.slane %v462_v50, 1  ;;  %v568_v60 = vadd.f32 %v567_v57, %v566_v39  ;;  %v520_v45 = vmul.f32 %v1241_v53, %v1241_v53 }
  0x55   : > { %v516_v63 = vadd.f32 %v515_v58, %v514_v16  ;;  %v418_v0 = vrot.slane %v417_v1, 4  ;;  %v470_v51 = vadd.f32 %v469_v24, %v467_v20  ;;  %v521_v37 = vmul.f32 %v487_v32, %v487_v32 }
  0x56   : > { %v410_v5 = vadd.f32 %v409_v4, %v408_v44  ;;  %v464_v6 = vadd.f32 %v463_v12, %v462_v50  ;;  %v569_v7 = vrot.slane %v568_v60, 2  ;;  %v522_v42 = vmul.f32 %v488_v61, %v488_v61 }
  0x57   : > { %v517_v10 = vrot.slane %v516_v63, 1  ;;  %v419_v11 = vadd.f32 %v418_v0, %v417_v1  ;;  %v471_v52 = vadd.f32 %v470_v51, %v468_v8  ;;  %v523_v13 = vadd.f32 %v520_v45, %v519_v59 }
  0x58   : > { %v427_v46 = vsel %vm424_vm15, %v410_v5, 0.0  ;;  %v481_v15 = vsel %vm478_vm14, %v464_v6, 0.0  ;;  %v570_v17 = vadd.f32 %v569_v7, %v568_v60  ;;  %v573_v53 = vmul.f32 %v1236_v48, %v1236_v48 }
  0x59   : > { %v482_v19 = vadd.f32 %v481_v15, %v427_v46  ;;  %v518_v32 = vadd.f32 %v517_v10, %v516_v63  ;;  %v420_v21 = vrot.slane %v419_v11, 2  ;;  %v472_v3 = vrot.slane %v471_v52, 4 }
  0x5a   : > { %v571_v22 = vrot.slane %v570_v17, 1  ;;  %v524_v61 = vadd.f32 %v523_v13, %v521_v37  ;;  %v574_v23 = vmul.f32 %v1243_v54, %v1243_v54  ;;  %v575_v25 = vmul.f32 %v1279_v47, %v1279_v47 }
  0x5b   : > { %v535_v9 = vsel %vm532_vm13, %v518_v32, 0.0  ;;  %v421_v27 = vadd.f32 %v420_v21, %v419_v11  ;;  %v473_v28 = vadd.f32 %v472_v3, %v471_v52  ;;  %v576_v48 = vmul.f32 %v1282_v14, %v1282_v14 }
  0x5c   : > { %v536_v33 = vadd.f32 %v535_v9, %v482_v19  ;;  %v572_v34 = vadd.f32 %v571_v22, %v570_v17  ;;  %v525_v30 = vadd.f32 %v524_v61, %v522_v42  ;;  %v577_v35 = vadd.f32 %v574_v23, %v573_v53 }
  0x5d   : > { %v422_v36 = vrot.slane %v421_v27, 1  ;;  %v474_v41 = vrot.slane %v473_v28, 2  ;;  %vm593_vm4 = vcmask 1043456   ;;  %v588_v49 = vadd.f32 %v587_v31, %v1293_v26 }
  0x5e   : > { %v589_v54 = vsel %vm586_vm0, %v572_v34, 0.0  ;;  %v526_v29 = vrot.slane %v525_v30, 4  ;;  %v578_v47 = vadd.f32 %v577_v35, %v575_v25  ;;  %v1050_v5 = vmov 0  }
  0x5f   : > { %v590_v40 = vadd.f32 %v589_v54, %v536_v33  ;;  %v475_v38 = vadd.f32 %v474_v41, %v473_v28  ;;  %v423_v39 = vadd.f32 %v422_v36, %v421_v27  ;;  %v594_v44 = vsel %vm593_vm4, %v588_v49, 0.0  ;;  %984 = vset.pattern.permute.xlu0 %v1050_v5  ;;  %983 = vset.pattern.permute.xlu1 %v1050_v5 }
  0x60   : > { %v527_v55 = vadd.f32 %v526_v29, %v525_v30  ;;  %v579_v16 = vadd.f32 %v578_v47, %v576_v48  ;;  %vm271_vm5 = vcmask 24576   ;;  %v1051_v6 = vmov 1966171168  }
  0x61   : > { %v597_v14 = vsel %vm593_vm4, %v590_v40, 0.0  ;;  %v476_v56 = vrot.slane %v475_v38, 1  ;;  %v429_v57 = vsel %vm424_vm15, %v423_v39, 0.0  ;;  %273 = vst.msk [vmem:[%s1336_s29] sm:$0x1] %vm271_vm5, %v1049_v2  ;;  %v627_v7 = vunpack.c.l.s4 %v1051_v6 }
  0x62   : > { %598 = vadd.xlane.f32.xlu0 %v597_v14  ;;  %v528_v43 = vrot.slane %v527_v55, 2  ;;  %v580_v20 = vrot.slane %v579_v16, 4  ;;  %v610_v11 = vsub.s32 0, %v1220_v18  ;;  %v614_v52 = vsub.s32 1, %v1220_v18  ;;  %272 = vst.msk [vmem:[%s260_s6] sm:$0x1] %vm271_vm5, %v1049_v2 }
  0x63   : > { %v477_v50 = vadd.f32 %v476_v56, %v475_v38  ;;  %v628_v10 = vunpack.c.0.s8 %v627_v7  ;;  %v618_v13 = vsub.s32 2, %v1220_v18  ;;  %v622_v46 = vsub.s32 3, %v1220_v18  ;;  %274 = vst.msk [vmem:[%s266_s9] sm:$0x1] %vm271_vm5, %v1049_v2 }
  0x64   : > { %v529_v8 = vadd.f32 %v528_v43, %v527_v55  ;;  %v581_v58 = vadd.f32 %v580_v20, %v579_v16 }
  0x65   : > { %v483_v26 = vsel %vm478_vm14, %v477_v50, 0.0  ;;  %v1346_v17 = vsub.s32 %v628_v10, %v1220_v18 }
  0x66   : > { %595 = vadd.xlane.f32.xlu0 %v594_v44  ;;  %v530_v31 = vrot.slane %v529_v8, 1  ;;  %v582_v1 = vrot.slane %v581_v58, 2  ;;  %v484_v24 = vadd.f32 %v483_v26, %v429_v57  ;;  %v652_v57 = vand.u32 127, %v375_v62 }
  0x68   : > { %v531_v59 = vadd.f32 %v530_v31, %v529_v8  ;;  %v583_v4 = vadd.f32 %v582_v1, %v581_v58  ;;  %v655_v8 = vsub.s32 %v652_v57, %v1220_v18  ;;  %v675_v1 = vld [vmem:[%s1336_s29] sm:$0x1] }
  0x69   : > { %v606_v2 = vld [vmem:[%s260_s6] sm:$0x1] }
  0x6a   : > { %v537_v12 = vsel %vm532_vm13, %v531_v59, 0.0  ;;  %v584_v60 = vrot.slane %v583_v4, 1 }
  0x6b   : > { %v538_v45 = vadd.f32 %v537_v12, %v484_v24 }
  0x6c   : > { %v585_v63 = vadd.f32 %v584_v60, %v583_v4 }
  0x6e   : > { %v591_v0 = vsel %vm586_vm0, %v585_v63, 0.0 }
  0x6f   : > { %v592_v51 = vadd.f32 %v591_v0, %v538_v45 }
  0x71   : > { %v600_v37 = vsel %vm593_vm4, %v592_v51, 0.0  ;;  %v741_v51 = vld [vmem:[%s266_s9] sm:$0x1] }
  0x72   : > { %601 = vadd.xlane.f32.xlu1 %v600_v37 }
  0xef   : > { %v599_v42 = vpop.xlane.xlu0 %598 }
  0xf0   : > { %v603_v25 = vmul.f32 2.0, %v599_v42 }
  0xf3   : > { %v596_v15 = vpop.xlane.xlu0 %595 }
  0xf4   : > { %v680_v53 = vrot.slane %v596_v15, %v610_v11  ;;  %v684_v19 = vrot.slane %v596_v15, %v614_v52  ;;  %v688_v32 = vrot.slane %v596_v15, %v618_v13  ;;  %v692_v21 = vrot.slane %v596_v15, %v622_v46 }
  0xf5   : > { %v604_v27 = vsub.f32 %v596_v15, %v603_v25 }
  0xf6   : > { %v693_v3 = vcombine.low %v680_v53, %v684_v19  ;;  %v694_v22 = vcombine.low %v688_v32, %v692_v21 }
  0xf8   : > { %v701_v61 = vrot.slane %v693_v3, %v1346_v17  ;;  %v708_v23 = vrot.slane %v694_v22, %v1346_v17 }
  0xfa   : > { %v709_v9 = vcombine.low %v701_v61, %v708_v23 }
  0xfc   : > { %v716_v28 = vrot.slane %v709_v9, %v1346_v17 }
  0xfe   : > { %718 = vperm.xlu0 %984, %v716_v28  }
  0xff   : > { %v602_v48 = vpop.xlane.xlu1 %601 }
 0x100   : > { %v605_v33 = vadd.f32 %v604_v27, %v602_v48  ;;  %v746_v34 = vrot.slane %v602_v48, %v610_v11  ;;  %v750_v30 = vrot.slane %v602_v48, %v614_v52  ;;  %v754_v35 = vrot.slane %v602_v48, %v618_v13 }
 0x101   : > { %v758_v36 = vrot.slane %v602_v48, %v622_v46 }
 0x102   : > { %v611_v41 = vrot.slane %v605_v33, %v610_v11  ;;  %v615_v54 = vrot.slane %v605_v33, %v614_v52  ;;  %v619_v29 = vrot.slane %v605_v33, %v618_v13  ;;  %v623_v47 = vrot.slane %v605_v33, %v622_v46 }
 0x103   : > { %v759_v40 = vcombine.low %v746_v34, %v750_v30  ;;  %v760_v49 = vcombine.low %v754_v35, %v758_v36 }
 0x104   : > { %v624_v38 = vcombine.low %v611_v41, %v615_v54  ;;  %v625_v39 = vcombine.low %v619_v29, %v623_v47 }
 0x105   : > { %v767_v14 = vrot.slane %v759_v40, %v1346_v17  ;;  %v774_v56 = vrot.slane %v760_v49, %v1346_v17 }
 0x106   : > { %v632_v55 = vrot.slane %v624_v38, %v1346_v17  ;;  %v639_v16 = vrot.slane %v625_v39, %v1346_v17 }
 0x107   : > { %v775_v44 = vcombine.low %v767_v14, %v774_v56 }
 0x108   : > { %v640_v43 = vcombine.low %v632_v55, %v639_v16 }
 0x109   : > { %v782_v50 = vrot.slane %v775_v44, %v1346_v17 }
 0x10a   : > { %v647_v20 = vrot.slane %v640_v43, %v1346_v17 }
 0x10c   : > { %649 = vperm.xlu1 %983, %v647_v20  }
 0x110   : > { %784 = vperm.xlu1 %983, %v782_v50  }
 0x17d   : > { %v719_v58 = vpop.permute.xlu0 %718 }
 0x17e   : > { %v723_v26 = vrot.slane %v719_v58, %v655_v8 }
 0x180   : > { %v730_v31 = vrot.slane %v723_v26, %v1346_v17 }
 0x182   : > { %v737_v24 = vrot.slane %v730_v31, %v1346_v17 }
 0x184   : > { %v739_v59 = vadd.f32 %v737_v24, %v675_v1 }
 0x186   : > { %740 = vst.msk [vmem:[%s1336_s29] sm:$0x1] %vm271_vm5, %v739_v59 }
 0x18b   : > { %v650_v4 = vpop.permute.xlu1 %649 }
 0x18c   : > { %v656_v12 = vrot.slane %v650_v4, %v655_v8 }
 0x18e   : > { %v663_v60 = vrot.slane %v656_v12, %v1346_v17 }
 0x18f   : > { %v785_v45 = vpop.permute.xlu1 %784 }
 0x190   : > { %v670_v62 = vrot.slane %v663_v60, %v1346_v17  ;;  %v789_v63 = vrot.slane %v785_v45, %v655_v8 }
 0x192   : > { %v672_v18 = vadd.f32 %v670_v62, %v606_v2  ;;  %v796_v0 = vrot.slane %v789_v63, %v1346_v17 }
 0x194   : > { %674 = vst.msk [vmem:[%s260_s6] sm:$0x1] %vm271_vm5, %v672_v18  ;;  %v803_v37 = vrot.slane %v796_v0, %v1346_v17 }
 0x196   : > { %v805_v5 = vadd.f32 %v803_v37, %v741_v51 }
 0x198   : > { %806 = vst.msk [vmem:[%s266_s9] sm:$0x1] %vm271_vm5, %v805_v5 }
 0x199 PF: > { %s15_s17 = sadd.s32 1, %s1047_s17   ;;  %s1402_s15 = smov %s1043_s16 }
 0x19a   : > { %p12_p5 = scmp.ge.s32.totalorder %s15_s17, 4   ;;  %s1403_s16 = smov %s1405_s18 }
 0x19c   :  { %14 = sbr.rel (!%p12_p5) target bundleno = 2 (0x2), region = 92 }

</bundles_post_ra>
